<compile_context>
chip_gen: v7x
topology: tpu7x:2x2x1
jax: 0.10.0
libtpu: 0.0.40
codegen_flags: <defaults>
</compile_context>

<pallas_src>
import functools

import jax
import jax.numpy as jnp
from jax.experimental import pallas as pl
from jax.experimental.pallas import tpu as pltpu


def _round_up(n, m):
    return ((n + m - 1) // m) * m


def _vmem_capacity_bytes():
    # v7x: 64 MiB per TensorCore; v5e/v6e: 128 MiB.  Fall back to the smaller
    # figure if the query is unavailable so the budget is always physically safe.
    try:
        return int(pltpu.get_tpu_info().vmem_capacity_bytes)
    except Exception:
        return 64 * 1024 * 1024


def _plan_tiles(V, K, Cp, Vd, B):
    """Pick (tile_v, Vp, tile_d, Vdp, n_dt, vmem_limit) from the VMEM budget."""
    cap = _vmem_capacity_bytes()
    budget = int(cap * 0.85)  # headroom for compiler-internal scratch

    # Pooled-row tiling: when B > 1 the batch axis already feeds both v7x
    # TensorCores; when B == 1 split the pooled rows so the 2nd core has work.
    Vd8 = _round_up(Vd, 8)
    tile_d = Vd8 if B > 1 else _round_up(max(8, (Vd + 1) // 2), 8)
    Vdp = _round_up(Vd8, tile_d)
    n_dt = Vdp // tile_d

    base = _round_up(V, 128)
    tile_v, Vp, need = 128, base, None
    for cand in (2048, 1024, 512, 256, 128):
        if cand > base:
            continue
        vp = _round_up(V, cand)
        if cand != 128 and (vp - V) > max(V // 8, 128):
            continue  # keep zero-padding of the gathered HBM stream small
        fixed = (2 * K * Cp * 2          # weight (bf16), default double-buffered
                 + 2 * Cp * 4            # bias (f32)
                 + 2 * Vdp * vp * 4      # resident f32 D, default double-buffered
                 + 3 * tile_d * Cp * 4)  # acc scratch + double-buffered out block
        per_row = 2 * K * 2 + Cp * 4     # xg stream (2 buffers) + f32 h intermediate
        est = fixed + cand * per_row
        if est <= budget or cand == 128:
            tile_v, Vp, need = cand, vp, est
            break

    vmem_limit = int(min(budget, max(32 << 20, need + (4 << 20))))
    vmem_limit = max(vmem_limit, min(need, budget))
    return tile_v, Vp, tile_d, Vdp, n_dt, vmem_limit


def spiral_enblock_kernel(xg_ref, w_ref, b_ref, d_ref, o_ref, acc_ref, *,
                          tile_v, tile_d):
    # xg_ref : (1, tile_v, K)  bf16  gathered spiral features, this batch/vertex tile
    # w_ref  : (K, Cp)         bf16  linear weight, (in, out) layout, Cout zero-padded
    # b_ref  : (1, Cp)         f32   bias (zero-padded)
    # d_ref  : (Vdp, Vp)       f32   dense down-transform, fully VMEM-resident
    # o_ref  : (1, tile_d, Cp)       pooled output rows for this (batch, row-tile)
    # acc_ref: (tile_d, Cp)    f32   pooling accumulator (VMEM scratch)
    d_i = pl.program_id(1)
    v_i = pl.program_id(2)

    @pl.when(v_i == 0)
    def _init():
        acc_ref[...] = jnp.zeros_like(acc_ref)

    # SpiralConv linear: bf16 operands, f32 accumulation on the MXU.
    h = jnp.dot(xg_ref[0], w_ref[...], preferred_element_type=jnp.float32)
    h = h + b_ref[...]
    # ELU (alpha = 1.0, PyTorch F.elu default); kept in f32, exp runs on the EUP
    # slot and overlaps the MXU passes.
    h = jnp.where(h > 0, h, jnp.exp(jnp.minimum(h, 0.0)) - 1.0)

    # Partial pooling: rows [d0, d0+tile_d) of the resident f32 D against this
    # vertex tile, accumulated over vertex tiles (f32 for pooling precision).
    v0 = pl.multiple_of(v_i * tile_v, 128)
    d0 = pl.multiple_of(d_i * tile_d, 8)
    d_tile = d_ref[pl.ds(d0, tile_d), pl.ds(v0, tile_v)]
    acc_ref[...] += jnp.dot(d_tile, h, preferred_element_type=jnp.float32)

    @pl.when(v_i == pl.num_programs(2) - 1)
    def _finalize():
        o_ref[0] = acc_ref[...].astype(o_ref.dtype)


def spiral_enblock(x, indices, weight, bias, down_dense):
    """x: (B, V, C_in) f32; indices: (V, S) int32; weight: (C_out, S*C_in);
    bias: (C_out,); down_dense: (V_down, V) dense down_transform.
    Returns (B, V_down, C_out)."""
    B, V, Cin = x.shape
    Vn, S = indices.shape
    assert Vn == V
    Cout, K = weight.shape
    assert K == S * Cin
    Vd = down_dense.shape[0]

    Cp = _round_up(Cout, 128)
    tile_v, Vp, tile_d, Vdp, n_dt, vmem_limit = _plan_tiles(V, K, Cp, Vd, B)
    n_vt = Vp // tile_v

    # ---- host-side prep ------------------------------------------------------
    # TODO(synk): move the spiral gather in-kernel (scalar-prefetched indices +
    # per-batch VMEM-resident x, or a DMA gather) to drop the remaining S-x HBM
    # inflation; kept in XLA for lowering robustness, but emitted in bf16 with an
    # UNPADDED feature dim K so the stream is not additionally inflated by Kp/K.
    xg = jnp.take(x, indices.reshape(-1), axis=1).reshape(B, V, K)
    xg = jnp.pad(xg.astype(jnp.bfloat16), ((0, 0), (0, Vp - V), (0, 0)))

    # Weight in (K, Cp) layout; only the output channels are zero-padded so the
    # in-kernel store is lane-dense.
    w_t = jnp.zeros((K, Cp), jnp.bfloat16).at[:, :Cout].set(
        weight.T.astype(jnp.bfloat16))
    b2 = jnp.zeros((1, Cp), jnp.float32).at[0, :Cout].set(bias.astype(jnp.float32))

    # Down-transform stays in f32 (pooling precision) and is made fully
    # VMEM-resident (constant index_map -> DMA'd once, never per batch).
    # INVARIANT: columns v >= V and rows d >= Vd are exactly zero; they cancel
    # the nonzero h = ELU(bias) produced by the zero-padded vertex rows of xg.
    # TODO(synk): if the dense pooling matmul becomes the bottleneck, switch to a
    # scalar-prefetched CSR (row, col, val) scatter-add and drop the dense D.
    d_pad = jnp.zeros((Vdp, Vp), jnp.float32).at[:Vd, :V].set(
        down_dense.astype(jnp.float32))

    kernel = functools.partial(spiral_enblock_kernel, tile_v=tile_v, tile_d=tile_d)

    # NOTE: weight / bias / D are grid-invariant; their default double-buffering
    # is accounted for in the VMEM budget (pl.Buffered(1) would halve it but is
    # left at the default for lowering robustness across generations).
    out = pl.pallas_call(
        kernel,
        out_shape=jax.ShapeDtypeStruct((B, Vdp, Cp), x.dtype),
        grid=(B, n_dt, n_vt),
        in_specs=[
            pl.BlockSpec((1, tile_v, K), lambda b, d, v: (b, v, 0)),
            pl.BlockSpec((K, Cp), lambda b, d, v: (0, 0)),
            pl.BlockSpec((1, Cp), lambda b, d, v: (0, 0)),
            pl.BlockSpec((Vdp, Vp), lambda b, d, v: (0, 0)),
        ],
        out_specs=pl.BlockSpec((1, tile_d, Cp), lambda b, d, v: (b, d, 0)),
        scratch_shapes=[pltpu.VMEM((tile_d, Cp), jnp.float32)],
        compiler_params=pltpu.CompilerParams(
            dimension_semantics=("parallel", "parallel", "arbitrary"),
            vmem_limit_bytes=vmem_limit,
        ),
    )(xg, w_t, b2, d_pad)

    # Consumers that tolerate the (Vdp, Cp)-padded tensor can skip this slice
    # (it is one extra XLA copy); kept to honor the module's output contract.
    return out[:, :Vd, :Cout]


if __name__ == "__main__":
    # Small, forward-consistent shapes.
    B, V, Cin, Cout, S, Vd = 2, 16, 4, 32, 8, 8

    key = jax.random.PRNGKey(0)
    k_x, k_idx, k_w, k_col, k_val = jax.random.split(key, 5)

    x = jax.random.normal(k_x, (B, V, Cin), dtype=jnp.float32)

    # Spiral neighbor indices (V, S), values in [0, V).
    indices = jax.random.randint(k_idx, (V, S), 0, V, dtype=jnp.int32)

    # SpiralConv parameters: Linear(S*Cin -> Cout), xavier_uniform weight, zero bias.
    fan_in, fan_out = S * Cin, Cout
    limit = (6.0 / (fan_in + fan_out)) ** 0.5
    weight = jax.random.uniform(
        k_w, (Cout, S * Cin), minval=-limit, maxval=limit, dtype=jnp.float32)
    bias = jnp.zeros((Cout,), dtype=jnp.float32)

    # down_transform: synthetic sparse matrix (V_down, V) with 2 nnz per row,
    # densified so Pool's index_select * value + scatter_add == D @ h exactly.
    rows = jnp.repeat(jnp.arange(Vd), 2)
    cols = jax.random.randint(k_col, (Vd * 2,), 0, V, dtype=jnp.int32)
    vals = jax.random.uniform(k_val, (Vd * 2,), minval=0.2, maxval=0.8,
                              dtype=jnp.float32)
    down_dense = jnp.zeros((Vd, V), jnp.float32).at[rows, cols].add(vals)

    out = spiral_enblock(x, indices, weight, bias, down_dense)
    out = jax.block_until_ready(out)

    # Pure-f32 JAX reference.  Only the SpiralConv matmul uses bf16 operands in
    # the kernel (f32 accumulation; pooling is full f32), so a moderate tolerance
    # suffices.
    xg_ref = jnp.take(x, indices.reshape(-1), axis=1).reshape(B, V, S * Cin)
    h_ref = xg_ref @ weight.T + bias
    h_ref = jnp.where(h_ref > 0, h_ref, jnp.expm1(h_ref))
    ref = jnp.einsum("dv,bvc->bdc", down_dense, h_ref)

    assert out.shape == (B, Vd, Cout)
    assert jnp.allclose(out, ref, atol=3e-2, rtol=3e-2)
    print("KERNEL_OK")
</pallas_src>

<mosaic_0001>
module attributes {stable_mosaic.version = 11 : i64} {
  func.func @spiral_enblock_kernel(%arg0: i32, %arg1: i32, %arg2: i32, %arg3: memref<1x128x32xbf16, #tpu.memory_space<vmem>>, %arg4: memref<32x128xbf16, #tpu.memory_space<vmem>>, %arg5: memref<1x128xf32, #tpu.memory_space<vmem>>, %arg6: memref<8x128xf32, #tpu.memory_space<vmem>>, %arg7: memref<1x8x128xf32, #tpu.memory_space<vmem>>, %arg8: memref<8x128xf32, #tpu.memory_space<vmem>>) attributes {dimension_semantics = [#tpu.dimension_semantics<parallel>, #tpu.dimension_semantics<parallel>, #tpu.dimension_semantics<arbitrary>], iteration_bounds = array<i64: 2, 1, 1>, scalar_prefetch = 0 : i64, scratch_operands = 1 : i64, tpu.core_type = #tpu.core_type<tc>, window_params = [{transform_indices = @transform_0, window_bounds = array<i64: 1, 128, 32>}, {pipeline_mode = #tpu.pipeline_mode<synchronous>, transform_indices = @transform_1, window_bounds = array<i64: 32, 128>}, {pipeline_mode = #tpu.pipeline_mode<synchronous>, transform_indices = @transform_2, window_bounds = array<i64: 1, 128>}, {pipeline_mode = #tpu.pipeline_mode<synchronous>, transform_indices = @transform_3, window_bounds = array<i64: 8, 128>}, {transform_indices = @transform_4, window_bounds = array<i64: 1, 8, 128>}]} {
    %c0_i32 = arith.constant 0 : i32
    %0 = arith.cmpi eq, %arg2, %c0_i32 : i32
    %1 = arith.extui %0 : i1 to i32
    %c0_i32_0 = arith.constant 0 : i32
    %2 = arith.cmpi ne, %1, %c0_i32_0 : i32
    scf.if %2 {
      %cst_17 = arith.constant 0.000000e+00 : f32
      %32 = vector.broadcast %cst_17 : f32 to vector<8x128xf32>
      %c0_18 = arith.constant 0 : index
      %c0_19 = arith.constant 0 : index
      %33 = vector.load %arg8[%c0_18, %c0_19] : memref<8x128xf32, #tpu.memory_space<vmem>>, vector<8x128xf32>
      tpu.vector_store %arg8[%c0_18, %c0_19], %32 {strides = array<i32>} : memref<8x128xf32, #tpu.memory_space<vmem>>, vector<8x128xf32>,
    } else {
    }
    %c0 = arith.constant 0 : index
    %c0_1 = arith.constant 0 : index
    %c0_2 = arith.constant 0 : index
    %3 = vector.load %arg3[%c0, %c0_1, %c0_2] : memref<1x128x32xbf16, #tpu.memory_space<vmem>>, vector<1x128x32xbf16>
    %4 = vector.shape_cast %3 : vector<1x128x32xbf16> to vector<128x32xbf16>
    %c0_3 = arith.constant 0 : index
    %c0_4 = arith.constant 0 : index
    %5 = vector.load %arg4[%c0_3, %c0_4] : memref<32x128xbf16, #tpu.memory_space<vmem>>, vector<32x128xbf16>
    %cst = arith.constant dense<0.000000e+00> : vector<128x128xf32>
    %6 = tpu.matmul %4, %5, %cst {dimension_numbers = #tpu.dot_dimension_numbers<[1], [0], [0], [1], [0, 0, 1, 1], [], []>} : vector<128x32xbf16>, vector<32x128xbf16>, vector<128x128xf32> -> vector<128x128xf32>
    %c0_5 = arith.constant 0 : index
    %c0_6 = arith.constant 0 : index
    %7 = vector.load %arg5[%c0_5, %c0_6] : memref<1x128xf32, #tpu.memory_space<vmem>>, vector<1x128xf32>
    %8 = vector.broadcast %7 : vector<1x128xf32> to vector<128x128xf32>
    %9 = arith.addf %6, %8 : vector<128x128xf32>
    %cst_7 = arith.constant 0.000000e+00 : f32
    %10 = vector.broadcast %cst_7 : f32 to vector<128x128xf32>
    %11 = arith.cmpf ogt, %9, %10 : vector<128x128xf32>
    %cst_8 = arith.constant 0.000000e+00 : f32
    %12 = vector.broadcast %cst_8 : f32 to vector<128x128xf32>
    %13 = arith.minimumf %9, %12 : vector<128x128xf32>
    %14 = math.exp %13 : vector<128x128xf32>
    %cst_9 = arith.constant 1.000000e+00 : f32
    %15 = vector.broadcast %cst_9 : f32 to vector<128x128xf32>
    %16 = arith.subf %14, %15 : vector<128x128xf32>
    %17 = arith.select %11, %9, %16 : vector<128x128xi1>, vector<128x128xf32>
    %c128_i32 = arith.constant 128 : i32
    %18 = arith.muli %arg2, %c128_i32 : i32
    %19 = tpu.assume_multiple %18, 128 : i32
    %c8_i32 = arith.constant 8 : i32
    %20 = arith.muli %arg1, %c8_i32 : i32
    %21 = tpu.assume_multiple %20, 8 : i32
    %22 = arith.index_cast %21 : i32 to index
    %23 = arith.index_cast %19 : i32 to index
    %24 = vector.load %arg6[%22, %23] : memref<8x128xf32, #tpu.memory_space<vmem>>, vector<8x128xf32>
    %c0_10 = arith.constant 0 : index
    %c0_11 = arith.constant 0 : index
    %25 = vector.load %arg8[%c0_10, %c0_11] : memref<8x128xf32, #tpu.memory_space<vmem>>, vector<8x128xf32>
    %cst_12 = arith.constant dense<0.000000e+00> : vector<8x128xf32>
    %26 = tpu.matmul %24, %17, %cst_12 {dimension_numbers = #tpu.dot_dimension_numbers<[1], [0], [0], [1], [0, 0, 1, 1], [], []>} : vector<8x128xf32>, vector<128x128xf32>, vector<8x128xf32> -> vector<8x128xf32>
    %27 = arith.addf %25, %26 : vector<8x128xf32>
    %c0_13 = arith.constant 0 : index
    %c0_14 = arith.constant 0 : index
    %28 = vector.load %arg8[%c0_13, %c0_14] : memref<8x128xf32, #tpu.memory_space<vmem>>, vector<8x128xf32>
    tpu.vector_store %arg8[%c0_13, %c0_14], %27 {strides = array<i32>} : memref<8x128xf32, #tpu.memory_space<vmem>>, vector<8x128xf32>,
    %c0_i32_15 = arith.constant 0 : i32
    %29 = arith.cmpi eq, %arg2, %c0_i32_15 : i32
    %30 = arith.extui %29 : i1 to i32
    %c0_i32_16 = arith.constant 0 : i32
    %31 = arith.cmpi ne, %30, %c0_i32_16 : i32
    scf.if %31 {
      %c0_17 = arith.constant 0 : index
      %c0_18 = arith.constant 0 : index
      %32 = vector.load %arg8[%c0_17, %c0_18] : memref<8x128xf32, #tpu.memory_space<vmem>>, vector<8x128xf32>
      %c0_19 = arith.constant 0 : index
      %c0_20 = arith.constant 0 : index
      %c0_21 = arith.constant 0 : index
      %33 = vector.load %arg7[%c0_19, %c0_20, %c0_21] : memref<1x8x128xf32, #tpu.memory_space<vmem>>, vector<1x8x128xf32>
      %34 = vector.shape_cast %33 : vector<1x8x128xf32> to vector<8x128xf32>
      %35 = vector.shape_cast %32 : vector<8x128xf32> to vector<1x8x128xf32>
      tpu.vector_store %arg7[%c0_19, %c0_20, %c0_21], %35 {strides = array<i32>} : memref<1x8x128xf32, #tpu.memory_space<vmem>>, vector<1x8x128xf32>,
    } else {
    }
    return
  }
  func.func @transform_0(%arg0: i32, %arg1: i32, %arg2: i32) -> (i32, i32, i32) {
    %c0_i32 = arith.constant 0 : i32
    %c0_i32_0 = arith.constant 0 : i32
    return %arg0, %arg2, %c0_i32 : i32, i32, i32
  }
  func.func @transform_1(%arg0: i32, %arg1: i32, %arg2: i32) -> (i32, i32) {
    %c0_i32 = arith.constant 0 : i32
    %c0_i32_0 = arith.constant 0 : i32
    %c0_i32_1 = arith.constant 0 : i32
    return %c0_i32, %c0_i32_0 : i32, i32
  }
  func.func @transform_2(%arg0: i32, %arg1: i32, %arg2: i32) -> (i32, i32) {
    %c0_i32 = arith.constant 0 : i32
    %c0_i32_0 = arith.constant 0 : i32
    %c0_i32_1 = arith.constant 0 : i32
    return %c0_i32, %c0_i32_0 : i32, i32
  }
  func.func @transform_3(%arg0: i32, %arg1: i32, %arg2: i32) -> (i32, i32) {
    %c0_i32 = arith.constant 0 : i32
    %c0_i32_0 = arith.constant 0 : i32
    %c0_i32_1 = arith.constant 0 : i32
    return %c0_i32, %c0_i32_0 : i32, i32
  }
  func.func @transform_4(%arg0: i32, %arg1: i32, %arg2: i32) -> (i32, i32, i32) {
    %c0_i32 = arith.constant 0 : i32
    %c0_i32_0 = arith.constant 0 : i32
    return %arg0, %arg1, %c0_i32 : i32, i32, i32
  }
}

</mosaic_0001>

<bundles_post_ra>
// kernel: tpu_custom_call.1
= control target key start
LH: loop header
LB: loop body
LE: loop exit
PB: predicated region body
PF: predicated region fallthrough
CT: control target
= control target key end

     0   :  { %9 = vsyncpa [#allocation4], 0  ;;  %s1320_s0 = inlined_call_operand.vmem [shape: bf16[2,128,32], index: 0, kind: input, shape index: {}]   ;;  %s1321_s1 = inlined_call_operand.vmem [shape: bf16[32,128], index: 1, kind: input, shape index: {}]   ;;  %s1322_s2 = inlined_call_operand.vmem [shape: f32[1,128], index: 2, kind: input, shape index: {}]   ;;  %s1323_s3 = inlined_call_operand.vmem [shape: f32[8,128], index: 3, kind: input, shape index: {}]   ;;  %s1324_s4 = inlined_call_operand.hbm [shape: f32[2,8,128], index: 4, kind: output, shape index: {}]  }
   0x1   :  { %11 = vsyncpa [#allocation4 + $0x1], 0  ;;  %s1079_s15 = smov 0   ;;  %s1081_s16 = smov 0  }
   0x2   :  { %s1083_s17 = smov 0   ;;  %s1085_s18 = smov 0  }
   0x3   :  { %s1087_s19 = smov 0   ;;  %s1089_s20 = smov 0  }
   0x4 LB: > { %s716_s21 = sadd.s32 4294967295, %s1048_s20   ;;  %s717_s22 = sadd.s32 4294967294, %s1048_s20   ;;  %s1048_s20 = sphi %s1089_s20, %s17_s20   ;;  %s1044_s19 = sphi %s1087_s19, %s1331_s19   ;;  %s1040_s18 = sphi %s1085_s18, %s1330_s18   ;;  %s1036_s17 = sphi %s1083_s17, %s1329_s17   ;;  %s1032_s16 = sphi %s1081_s16, %s1328_s16   ;;  %s1028_s15 = sphi %s1079_s15, %s1327_s15  }
   0x5   : > { %s36_s23 = sadd.s32 1, %s1044_s19  ;;  %s136_s24 = sadd.s32 1, %s1036_s17 }
   0x6   : > { %p38_p0 = scmp.ge.s32.totalorder %s36_s23, 2  ;;  %p146_p1 = scmp.ne.s32.totalorder %s1036_s17, %s1032_s16 }
   0x7   : > { %p147_p2 = scmp.eq.s32.totalorder %s716_s21, 1  ;;  %p152_p3 = scmp.ne.s32.totalorder %s1032_s16, %s1028_s15 }
   0x8   : > { %s1333_s23 = smov (%p38_p0, %s36_s23), 0  ;;  %p153_p5 = scmp.eq.s32.totalorder %s717_s22, 1 }
   0x9   : > { %p1119_p4 = por %p147_p2, %p146_p1  ;;  %s131_s26 = ssub.s32 %s1044_s19, %s1333_s23 }
   0xa   : > { %p720_p6 = scmp.ge.s32.totalorder %s1048_s20, 1  ;;  %p134_p7 = scmp.eq.s32.totalorder %s131_s26, 0 }
   0xb   : > { %p1126_p8 = por %p153_p5, %p152_p3  ;;  %p193_p9 = scmp.lt.s32.totalorder %s1048_s20, 3 }
   0xc   : > { %s1132_s28 = scalar_select %p134_p7, %s1036_s17, %s136_s24  }
   0xd   : > { %p194_p10 = pnand %p720_p6, %p193_p9 }
   0xe   : > { %v928_v0 = vld [vmem:[%s1321_s1] sm:$0xff] (!%p194_p10)   ;;  %p224_p11 = scmp.lt.s32.totalorder (!%p194_p10), %s1040_s18, 1  ;;  %v929_v1 = vld [vmem:[%s1321_s1 + $0x8] sm:$0xff] (!%p194_p10)   ;;  %vm318_vm0 = vcmask (!%p194_p10), 261120   ;;  %v1050_v10 = vmov (!%p194_p10), 0.0|0.0   ;;  %vm1051_vm1 = vmmov (!%p194_p10), 0  }
   0xf   : > { %197 = sbr.rel (%p194_p10) target bundleno = 522 (0x20a), region = 36  ;;  %791 = vmatprep.subr.bf16.mxu0 (!%p194_p10), %v928_v0  ;;  %846 = vmatprep.subr.bf16.mxu1 (!%p194_p10), %v1050_v10  ;;  %v1052_v11 = vmov (!%p194_p10), 0.0   ;;  %v1157_v12 = vld [vmem:[%s1322_s2] ss:$0 sm:$0xff] (!%p194_p10)  ;;  %s220_s22 = sand.u32 (!%p194_p10), 1, %s1032_s16  }
  0x10   : > { %792 = vmatpush3.bf16.msra.mxu0 (!%p194_p10), %v928_v0  ;;  %843 = vmatprep.mubr.msk.f32.mxu1 (!%p194_p10), %vm1051_vm1, %v1052_v11  ;;  %s721_s24 = sshll.u32 (!%p194_p10), %s220_s22, 3  ;;  %s760_s30 = sshll.u32 (!%p194_p10), %s1040_s18, 7 }
  0x11   : > { %793 = vmatprep.subr.bf16.mxu0 (!%p194_p10), %v929_v1  ;;  %s222_s26 = scalar_lea.vmem (!%p194_p10), [#allocation3], %s721_s24 }
  0x12   : > { %s636_s29 = sshll.u32 (!%p194_p10), %s222_s26, 4  ;;  %s1270_s29 = int_to_ptr.vmem [resolvable:$true] %s636_s29 }
  0x13   : > { %s970_s9 = scalar_lea.vmem (!%p194_p10), %s1270_s29, 128 }
  0x14   : > { %794 = vmatpush3.bf16.msra.mxu0 (!%p194_p10), %v929_v1  ;;  %p971_p12 = scmp.ne.s32.totalorder (!%p194_p10), %s1270_s29, %s970_s9 }
  0x16   : > { %s225_s7 = scalar_select %p224_p11, %s1040_s18, 1 }
  0x17   : > { %p972_p13 = pnand %p971_p12, %p1119_p4  ;;  %s1053_s18 = smov [#allocation3]  }
  0x18   : > { %s763_s8 = sshll.u32 %s225_s7, 6  ;;  %s1275_s7 = scalar_lea.hbm %s1324_s4, %s760_s30 }
  0x19   : > { %s231_s11 = scalar_lea.vmem %s1320_s0, %s763_s8  ;;  %s622_s8 = scalar_lea.sflag [#allocation4], %s220_s22 }
  0x1a   : > { %v930_v2 = vld [vmem:[%s231_s11] sm:$0xff]   ;;  %v931_v3 = vld [vmem:[%s231_s11 + $0x8] sm:$0xff]   ;;  %v932_v4 = vld [vmem:[%s231_s11 + $0x10] sm:$0xff]   ;;  %p973_p0 = pneg %p972_p13  ;;  %s974_s10 = sshll.u32 %s1053_s18, 4  ;;  %s975_s10 = int_to_ptr.vmem [resolvable:$false] %s974_s10 }
  0x1b   : > { %795 = vmatprep.mubr.msk.bf16.mxu0 %vm318_vm0, %v930_v2  ;;  %v933_v5 = vld [vmem:[%s231_s11 + $0x18] sm:$0xff]   ;;  %v934_v6 = vld [vmem:[%s231_s11 + $0x20] sm:$0xff]   ;;  %v935_v7 = vld [vmem:[%s231_s11 + $0x28] sm:$0xff]   ;;  %p977_p1 = scmp.lt.s32.totalorder %s1270_s29, %s975_s10 }
  0x1c   : > { %796 = vmatmul.mubr.msk.bf16.vlgmr.msra.gmra.mrb[0].mxu0 %vm318_vm0, %v931_v3  ;;  %v936_v8 = vld [vmem:[%s231_s11 + $0x30] sm:$0xff]   ;;  %v937_v9 = vld [vmem:[%s231_s11 + $0x38] sm:$0xff]   ;;  %s976_s11 = scalar_lea.vmem %s975_s10, 256 }
  0x1d   : > { %799 = vmatprep.mubr.msk.bf16.mxu0 %vm318_vm0, %v932_v4  ;;  %p978_p2 = scmp.lt.s32.totalorder %s976_s11, %s970_s9 }
  0x1f   : > { %p979_p3 = por %p978_p2, %p977_p1 }
  0x21   : > { %p980_p5 = pnand %p979_p3, %p973_p0 }
  0x24   : > { %800 = vmatmul.mubr.msk.bf16.gmra.mrb[4].mxu0 %vm318_vm0, %v933_v5 }
  0x25   : > { %803 = vmatprep.mubr.msk.bf16.mxu0 %vm318_vm0, %v934_v6 }
  0x2c   : > { %804 = vmatmul.mubr.msk.bf16.gmra.mrb[8].mxu0 %vm318_vm0, %v935_v7 }
  0x2d   : > { %807 = vmatprep.mubr.msk.bf16.mxu0 %vm318_vm0, %v936_v8 }
  0x34   : > { %808 = vmatmul.mubr.msk.bf16.gmra.mrb[12].mxu0 %vm318_vm0, %v937_v9 }
  0xef   : > { %v797_v13 = vpop.f32.mrb[0].mxu0 }
  0xf0   : > { %v1160_v14 = vadd.f32 %v797_v13, %v1157_v12  ;;  %v377_v15 = vpop.f32.mrb[1].mxu0 }
  0xf1   : > { %v1163_v16 = vadd.f32 %v1157_v12, %v377_v15  ;;  %v798_v17 = vpop.f32.mrb[2].mxu0 }
  0xf2   : > { %v458_v18 = vmin.f32 %v1160_v14, 0.0  ;;  %v1167_v19 = vadd.f32 %v798_v17, %v1157_v12  ;;  %v380_v20 = vpop.f32.mrb[3].mxu0  ;;  %vm442_vm2 = vcmp.gt.f32.partialorder %v1160_v14, 0.0 }
  0xf3   : > { %v456_v21 = vmin.f32 %v1163_v16, 0.0  ;;  %v381_v22 = vadd.f32 %v1157_v12, %v380_v20  ;;  %vm440_vm3 = vcmp.gt.f32.partialorder %v1163_v16, 0.0 }
  0xf4   : > { %v476_v23 = vmul.f32 1.442695, %v458_v18  ;;  %v459_v24 = vmin.f32 %v1167_v19, 0.0  ;;  %vm443_vm4 = vcmp.gt.f32.partialorder %v1167_v19, 0.0 }
  0xf5   : > { %v472_v25 = vmul.f32 1.442695, %v456_v21  ;;  %v457_v26 = vmin.f32 %v381_v22, 0.0  ;;  %vm441_vm5 = vcmp.gt.f32.partialorder %v381_v22, 0.0 }
  0xf6   : > { %938 = vpow2.f32 %v476_v23  ;;  %v478_v27 = vmul.f32 1.442695, %v459_v24 }
  0xf7   : > { %940 = vpow2.f32 %v472_v25  ;;  %v474_v28 = vmul.f32 1.442695, %v457_v26  ;;  %v801_v29 = vpop.f32.mrb[4].mxu0 }
  0xf8   : > { %942 = vpow2.f32 %v478_v27  ;;  %v1173_v30 = vadd.f32 %v801_v29, %v1157_v12  ;;  %v393_v31 = vpop.f32.mrb[5].mxu0 }
  0xf9   : > { %944 = vpow2.f32 %v474_v28  ;;  %v1176_v32 = vadd.f32 %v1157_v12, %v393_v31  ;;  %v802_v33 = vpop.f32.mrb[6].mxu0 }
  0xfa   : > { %v462_v34 = vmin.f32 %v1173_v30, 0.0  ;;  %v1180_v35 = vadd.f32 %v802_v33, %v1157_v12  ;;  %v396_v36 = vpop.f32.mrb[7].mxu0  ;;  %vm446_vm6 = vcmp.gt.f32.partialorder %v1173_v30, 0.0 }
  0xfb   : > { %v460_v37 = vmin.f32 %v1176_v32, 0.0  ;;  %v1184_v38 = vadd.f32 %v1157_v12, %v396_v36  ;;  %vm444_vm7 = vcmp.gt.f32.partialorder %v1176_v32, 0.0 }
  0xfc   : > { %v484_v39 = vmul.f32 1.442695, %v462_v34  ;;  %v463_v40 = vmin.f32 %v1180_v35, 0.0  ;;  %vm447_vm8 = vcmp.gt.f32.partialorder %v1180_v35, 0.0 }
  0xfd   : > { %v480_v41 = vmul.f32 1.442695, %v460_v37  ;;  %v461_v42 = vmin.f32 %v1184_v38, 0.0  ;;  %vm445_vm9 = vcmp.gt.f32.partialorder %v1184_v38, 0.0 }
  0xfe   : > { %946 = vpow2.f32 %v484_v39  ;;  %v486_v43 = vmul.f32 1.442695, %v463_v40 }
  0xff   : > { %948 = vpow2.f32 %v480_v41  ;;  %v482_v44 = vmul.f32 1.442695, %v461_v42  ;;  %v805_v45 = vpop.f32.mrb[8].mxu0 }
 0x100   : > { %v939_v46 = vpop.eup %938  ;;  %950 = vpow2.f32 %v486_v43  ;;  %v1189_v47 = vadd.f32 %v805_v45, %v1157_v12  ;;  %v409_v48 = vpop.f32.mrb[9].mxu0 }
 0x101   : > { %v941_v49 = vpop.eup %940  ;;  %952 = vpow2.f32 %v482_v44  ;;  %v1193_v50 = vadd.f32 %v1157_v12, %v409_v48  ;;  %v806_v51 = vpop.f32.mrb[10].mxu0  ;;  %v745_v53 = vadd.f32 -1.0, %v939_v46 }
 0x102   : > { %v943_v52 = vpop.eup %942  ;;  %v466_v54 = vmin.f32 %v1189_v47, 0.0  ;;  %v1197_v55 = vadd.f32 %v806_v51, %v1157_v12  ;;  %v412_v56 = vpop.f32.mrb[11].mxu0  ;;  %v743_v57 = vadd.f32 -1.0, %v941_v49  ;;  %vm450_vm10 = vcmp.gt.f32.partialorder %v1189_v47, 0.0 }
 0x103   : > { %v945_v58 = vpop.eup %944  ;;  %v746_v59 = vadd.f32 -1.0, %v943_v52  ;;  %v464_v60 = vmin.f32 %v1193_v50, 0.0  ;;  %v1201_v61 = vadd.f32 %v1157_v12, %v412_v56  ;;  %v522_v6 = vsel %vm442_vm2, %v1160_v14, %v745_v53 }
 0x104   : > { %v492_v62 = vmul.f32 1.442695, %v466_v54  ;;  %v467_v63 = vmin.f32 %v1197_v55, 0.0  ;;  %v744_v0 = vadd.f32 -1.0, %v945_v58  ;;  %v520_v3 = vsel %vm440_vm3, %v1163_v16, %v743_v57 }
 0x105   : > { %v488_v1 = vmul.f32 1.442695, %v464_v60  ;;  %v465_v2 = vmin.f32 %v1201_v61, 0.0  ;;  %v523_v11 = vsel %vm443_vm4, %v1167_v19, %v746_v59  ;;  %vm451_vm11 = vcmp.gt.f32.partialorder %v1197_v55, 0.0 }
 0x106   : > { %954 = vpow2.f32 %v492_v62  ;;  %v494_v4 = vmul.f32 1.442695, %v467_v63  ;;  %v521_v5 = vsel %vm441_vm5, %v381_v22, %v744_v0  ;;  %v850_v17 = vpack.c.bf16 %v523_v11, %v522_v6  ;;  %v542_v6 = vld [vmem:[%s1323_s3] sm:$0xff] }
 0x107   : > { %956 = vpow2.f32 %v488_v1  ;;  %v490_v7 = vmul.f32 1.442695, %v465_v2  ;;  %v809_v8 = vpop.f32.mrb[12].mxu0  ;;  %v847_v9 = vpack.c.bf16 %v521_v5, %v520_v3  ;;  %vm448_vm12 = vcmp.gt.f32.partialorder %v1193_v50, 0.0 }
 0x108   : > { %v947_v13 = vpop.eup %946  ;;  %958 = vpow2.f32 %v494_v4  ;;  %v1215_v15 = vadd.f32 %v809_v8, %v1157_v12  ;;  %v425_v16 = vpop.f32.mrb[13].mxu0  ;;  %vm449_vm13 = vcmp.gt.f32.partialorder %v1201_v61, 0.0 }
 0x109   : > { %v949_v18 = vpop.eup %948  ;;  %960 = vpow2.f32 %v490_v7  ;;  %v1219_v14 = vadd.f32 %v1157_v12, %v425_v16  ;;  %v810_v20 = vpop.f32.mrb[14].mxu0  ;;  %848 = vmatpush3.bf16.msra.mxu1 %v847_v9  ;;  %v749_v22 = vadd.f32 -1.0, %v947_v13 }
 0x10a   : > { %v951_v21 = vpop.eup %950  ;;  %v747_v23 = vadd.f32 -1.0, %v949_v18  ;;  %v470_v19 = vmin.f32 %v1215_v15, 0.0  ;;  %v1223_v24 = vadd.f32 %v810_v20, %v1157_v12  ;;  %v428_v25 = vpop.f32.mrb[15].mxu0  ;;  %849 = vmatprep.subr.bf16.mxu1 %v1050_v10  ;;  %vm454_vm14 = vcmp.gt.f32.partialorder %v1215_v15, 0.0 }
 0x10b   : > { %v953_v26 = vpop.eup %952  ;;  %v750_v27 = vadd.f32 -1.0, %v951_v21  ;;  %v468_v28 = vmin.f32 %v1219_v14, 0.0  ;;  %v1229_v29 = vadd.f32 %v1157_v12, %v428_v25  ;;  %v526_v41 = vsel %vm446_vm6, %v1173_v30, %v749_v22 }
 0x10c   : > { %v748_v31 = vadd.f32 -1.0, %v953_v26  ;;  %v500_v33 = vmul.f32 1.442695, %v470_v19  ;;  %v471_v34 = vmin.f32 %v1223_v24, 0.0  ;;  %v524_v39 = vsel %vm444_vm7, %v1176_v32, %v747_v23 }
 0x10d   : > { %v496_v36 = vmul.f32 1.442695, %v468_v28  ;;  %v469_v37 = vmin.f32 %v1229_v29, 0.0  ;;  %851 = vmatpush3.bf16.msra.mxu1 %v850_v17  ;;  %v527_v44 = vsel %vm447_vm8, %v1180_v35, %v750_v27  ;;  %vm455_vm15 = vcmp.gt.f32.partialorder %v1223_v24, 0.0 }
 0x10e   : > { %962 = vpow2.f32 %v500_v33  ;;  %v502_v40 = vmul.f32 1.442695, %v471_v34  ;;  %852 = vmatprep.subr.bf16.mxu1 %v1050_v10  ;;  %v525_v12 = vsel %vm445_vm9, %v1184_v38, %v748_v31  ;;  %v856_v32 = vpack.c.bf16 %v527_v44, %v526_v41 }
 0x10f   : > { %964 = vpow2.f32 %v496_v36  ;;  %v498_v42 = vmul.f32 1.442695, %v469_v37  ;;  %v853_v43 = vpack.c.bf16 %v525_v12, %v524_v39  ;;  %vm452_vm0 = vcmp.gt.f32.partialorder %v1219_v14, 0.0 }
 0x110   : > { %v955_v45 = vpop.eup %954  ;;  %966 = vpow2.f32 %v502_v40  ;;  %vm453_vm1 = vcmp.gt.f32.partialorder %v1229_v29, 0.0 }
 0x111   : > { %v957_v46 = vpop.eup %956  ;;  %v753_v48 = vadd.f32 -1.0, %v955_v45  ;;  %968 = vpow2.f32 %v498_v42  ;;  %854 = vmatpush3.bf16.msra.mxu1 %v853_v43 }
 0x112   : > { %v959_v49 = vpop.eup %958  ;;  %v751_v38 = vadd.f32 -1.0, %v957_v46  ;;  %855 = vmatprep.subr.bf16.mxu1 %v1050_v10 }
 0x113   : > { %v961_v51 = vpop.eup %960  ;;  %v754_v30 = vadd.f32 -1.0, %v959_v49  ;;  %v530_v35 = vsel %vm450_vm10, %v1189_v47, %v753_v48 }
 0x114   : > { %v752_v52 = vadd.f32 -1.0, %v961_v51  ;;  %v528_v54 = vsel %vm448_vm12, %v1193_v50, %v751_v38 }
 0x115   : > { %857 = vmatpush3.bf16.msra.mxu1 %v856_v32  ;;  %v531_v53 = vsel %vm451_vm11, %v1197_v55, %v754_v30 }
 0x116   : > { %858 = vmatprep.subr.bf16.mxu1 %v1050_v10  ;;  %v529_v56 = vsel %vm449_vm13, %v1201_v61, %v752_v52  ;;  %v862_v57 = vpack.c.bf16 %v531_v53, %v530_v35 }
 0x117   : > { %v859_v58 = vpack.c.bf16 %v529_v56, %v528_v54 }
 0x118   : > { %v963_v59 = vpop.eup %962 }
 0x119   : > { %v965_v60 = vpop.eup %964  ;;  %v757_v62 = vadd.f32 -1.0, %v963_v59  ;;  %860 = vmatpush3.bf16.msra.mxu1 %v859_v58 }
 0x11a   : > { %v967_v63 = vpop.eup %966  ;;  %v755_v0 = vadd.f32 -1.0, %v965_v60  ;;  %861 = vmatprep.subr.bf16.mxu1 %v1050_v10 }
 0x11b   : > { %v969_v1 = vpop.eup %968  ;;  %v758_v47 = vadd.f32 -1.0, %v967_v63  ;;  %v534_v50 = vsel %vm454_vm14, %v1215_v15, %v757_v62 }
 0x11c   : > { %v756_v55 = vadd.f32 -1.0, %v969_v1  ;;  %v532_v2 = vsel %vm452_vm0, %v1219_v14, %v755_v0 }
 0x11d   : > { %863 = vmatpush3.bf16.msra.mxu1 %v862_v57  ;;  %v535_v61 = vsel %vm455_vm15, %v1223_v24, %v758_v47 }
 0x11e   : > { %864 = vmatprep.subr.bf16.mxu1 %v1050_v10  ;;  %v533_v3 = vsel %vm453_vm1, %v1229_v29, %v756_v55  ;;  %v868_v4 = vpack.c.bf16 %v535_v61, %v534_v50 }
 0x11f   : > { %v865_v5 = vpack.c.bf16 %v533_v3, %v532_v2 }
 0x121   : > { %866 = vmatpush3.bf16.msra.mxu1 %v865_v5 }
 0x122   : > { %867 = vmatprep.subr.bf16.mxu1 %v1050_v10 }
 0x125   : > { %869 = vmatpush3.bf16.msra.mxu1 %v868_v4 }
 0x128   : > { %844 = vmatmul.mubr.f32.vlgmr.msra.gmra.mrb[0].mxu1 %v542_v6 }
 0x1fb   : > { %v610_v10 = vpop.f32.mrb[0].mxu1 }
 0x1fc   : > { %620 = vst [vmem:[%s222_s26] sm:$0xff] %v610_v10  ;;  %v845_v7 = vpop.f32.mrb[1].mxu1 }
 0x1fd   : > { %983 = shalt.err (!%p980_p5)
}
 0x1fe   : > { %s984_s12 = scalar_lea.hbm %s1275_s7, 128  ;;  %s988_s21 = scalar_lea.hbm %s1324_s4, 256 }
 0x1ff   : > { %p985_p6 = scmp.ne.s32.totalorder %s1275_s7, %s984_s12  ;;  %p989_p10 = scmp.lt.u32.totalorder %s1275_s7, %s1324_s4 }
 0x200   : > { %p990_p11 = scmp.lt.u32.totalorder %s988_s21, %s984_s12  ;;  %p992_p13 = scmp.lt.u32.totalorder %s984_s12, %s1275_s7 }
 0x201   : > { %p986_p7 = pnand %p985_p6, %p1119_p4 }
 0x202   : > { %p991_p12 = por %p990_p11, %p989_p10 }
 0x203   : > { %p987_p9 = pneg %p986_p7 }
 0x204   : > { %p993_p0 = por %p992_p13, %p991_p12 }
 0x206   : > { %p994_p1 = pnand %p993_p0, %p987_p9 }
 0x208   : > { %997 = shalt.err (!%p994_p1)
}
 0x209   : > { %870 = dma.vmem_to_hbm [thread:$0]  (%p1119_p4), %s1270_s29, 128, %s1275_s7, %s622_s8  }
 0x20a PF: > { %p876_p2 = scmp.ge.s32.totalorder %s1048_s20, 2  ;;  %s648_s26 = sand.u32 1, %s1028_s15  }
 0x20b   : > { %s649_s30 = scalar_lea.sflag [#allocation4], %s648_s26 }
 0x20c   : > { %p873_p3 = pnand %p876_p2, %p1126_p8 }
 0x20e   : > { %1023 = dma.done.wait (!%p873_p3), %s649_s30, 128  }
 0x20f   : > { %1025 = vsyncadd (!%p873_p3), %s649_s30, 4294967168  ;;  %s17_s20 = sadd.s32 1, %s1048_s20   ;;  %s1327_s15 = smov %s1032_s16 }
 0x210   : > { %p14_p5 = scmp.ge.s32.totalorder %s17_s20, 4   ;;  %s1328_s16 = smov %s1036_s17 }
 0x211   : > { %s1329_s17 = smov %s1132_s28  ;;  %s1330_s18 = smov %s1044_s19 }
 0x212   : > { %s1331_s19 = smov %s1333_s23  ;;  %16 = sbr.rel (!%p14_p5) target bundleno = 4 (0x4), region = 80 }
 0x219   :  { %654 = vsyncpa [#allocation4], 1 }
 0x21a   :  { %656 = vsyncpa [#allocation4 + $0x1], 1 }

</bundles_post_ra>
